<compile_context>
chip_gen: v6e
topology: v6e:2x2x1
jax: 0.10.0
libtpu: 0.0.40
codegen_flags: <defaults>
</compile_context>

<pallas_src>
import functools

import jax
import jax.numpy as jnp
import numpy as np
from jax import lax
from jax.experimental import pallas as pl
from jax.experimental.pallas import tpu as pltpu


def _resblock_kernel(x_ref, edge_ref, w1_ref, b1_ref, w2_ref, b2_ref,
                     w3s_ref, b3s_ref, o_ref, *, cm, tl):
    x = x_ref[0]                                                    # (Cin, TL)

    # conv1 (1x1) + ReLU:  h1 = relu(W1 @ x + b1)                   -> (Cm, TL), f32 accumulation
    h1 = jnp.dot(w1_ref[...], x, preferred_element_type=jnp.float32) + b1_ref[...]
    h1 = jnp.maximum(h1, 0.0)

    # conv2 (k=3, pad=1): three taps fused into ONE matmul over the shared stationary RHS h1.
    abc = jnp.dot(w2_ref[...], h1.astype(x.dtype),
                  preferred_element_type=jnp.float32)               # (3*Cm, TL)
    p0 = abc[0 * cm:1 * cm, :]   # tap k=0: acts on h1[:, t-1]  -> shift its product right by 1
    p1 = abc[1 * cm:2 * cm, :]   # tap k=1: acts on h1[:, t]
    p2 = abc[2 * cm:3 * cm, :]   # tap k=2: acts on h1[:, t+1]  -> shift its product left by 1

    col = lax.broadcasted_iota(jnp.int32, (cm, tl), 1)
    edge = edge_ref[0, 0]                                           # (Cm, 2) cross-tile halo terms
    p0_sh = jnp.where(col == 0,      edge[:, 0:1], pltpu.roll(p0, shift=1,      axis=1))
    p2_sh = jnp.where(col == tl - 1, edge[:, 1:2], pltpu.roll(p2, shift=tl - 1, axis=1))
    h2 = jnp.maximum(p0_sh + p1 + p2_sh + b2_ref[...], 0.0)         # (Cm, TL)

    # conv3 (1x1) + shortcut (1x1) fused:  [W3 | Ws] @ [h2; x] + (b3 + bs), then final ReLU.
    hx = jnp.concatenate([h2.astype(x.dtype), x], axis=0)           # (Cm + Cin, TL)
    y = jnp.dot(w3s_ref[...], hx, preferred_element_type=jnp.float32) + b3s_ref[...]
    o_ref[0] = jnp.maximum(y, 0.0).astype(o_ref.dtype)


def _vmem_capacity_bytes():
    try:
        return int(pltpu.get_tpu_info().vmem_capacity_bytes)
    except Exception:
        return 64 * 1024 * 1024          # conservative fallback (v7x per-TensorCore VMEM)


def _choose_l_tile(L, Cin, Cm, Cout):
    """Largest L tile (multiple of 128 dividing L, or L itself) whose working set stays well
    inside VMEM. Shrinks automatically on v7x (64 MiB) relative to v5e/v6e (128 MiB)."""
    budget = _vmem_capacity_bytes() // 8
    per_col = 4 * (2 * (Cin + Cout)              # double-buffered x / out blocks
                   + 8 * Cm + 2 * Cin + Cout)    # live (C, TL) f32 intermediates
    tl = budget // max(per_col, 1)
    if tl >= L or L <= 128:
        return L
    tl = max(128, (tl // 128) * 128)
    while tl >= 128 and L % tl != 0:             # keep the simple exact-tiling contract
        tl -= 128
    return tl if (tl >= 128 and L % tl == 0) else L


def resblock_forward(x, params, *, l_tile=None, compute_dtype=jnp.float32):
    """x: (N, Cin, L) float32 in PyTorch Conv1d NCL layout. Returns (N, Cout, L) float32.

    params are PyTorch-shaped Conv1d tensors (weight = (out, in, k)):
      w1 (Cm, Cin, 1), b1 (Cm,)   -- conv[0]
      w2 (Cm, Cm, 3),  b2 (Cm,)   -- conv[2]
      w3 (Cout, Cm,1), b3 (Cout,) -- conv[4]
      ws (Cout,Cin,1), bs (Cout,) -- shortcut (in_channel != out_channel case)

    compute_dtype=jnp.bfloat16 casts x and the weight matrices for the MXU (f32 accumulation kept).
    """
    w1, b1, w2, b2, w3, b3, ws, bs = params
    N, Cin, L = x.shape
    Cm = w1.shape[0]
    Cout = w3.shape[0]

    if l_tile is None:
        l_tile = _choose_l_tile(L, Cin, Cm, Cout)
    if L % l_tile != 0 or not (l_tile == L or l_tile % 128 == 0):
        raise ValueError(f"l_tile={l_tile} must divide L={L} and be a multiple of 128 (or == L)")
    T = L // l_tile

    hi = lax.Precision.HIGHEST

    # Packed / fused weights. Conv1d's (out, in) form is exactly what W @ X needs -- no transpose.
    w1m = w1[:, :, 0]                                                          # (Cm, Cin)
    w2cat = jnp.concatenate([w2[:, :, 0], w2[:, :, 1], w2[:, :, 2]], axis=0)   # (3Cm, Cm)
    w3s = jnp.concatenate([w3[:, :, 0], ws[:, :, 0]], axis=1)                  # (Cout, Cm+Cin)
    b1c = b1[:, None].astype(jnp.float32)
    b2c = b2[:, None].astype(jnp.float32)
    b3s = (b3 + bs)[:, None].astype(jnp.float32)

    # Cross-tile halo for the k=3 conv: each tile needs the tap-0 contribution of its left
    # neighbour's last h1 column and the tap-2 contribution of its right neighbour's first h1
    # column. Sequence boundaries stay zero (== padding=1 zero-pad of h1).
    edge = jnp.zeros((N, T, Cm, 2), jnp.float32)
    if T > 1:
        xl = x[:, :, l_tile - 1::l_tile][:, :, :T - 1]     # columns j*TL - 1,  j = 1..T-1
        xr = x[:, :, l_tile::l_tile]                       # columns (j+1)*TL,  j = 0..T-2
        h1l = jax.nn.relu(jnp.einsum('oc,ncj->noj', w1m, xl, precision=hi) + b1[None, :, None])
        h1r = jax.nn.relu(jnp.einsum('oc,ncj->noj', w1m, xr, precision=hi) + b1[None, :, None])
        el = jnp.einsum('oc,ncj->noj', w2[:, :, 0], h1l, precision=hi)
        er = jnp.einsum('oc,ncj->noj', w2[:, :, 2], h1r, precision=hi)
        edge = edge.at[:, 1:, :, 0].set(jnp.transpose(el, (0, 2, 1)))
        edge = edge.at[:, :T - 1, :, 1].set(jnp.transpose(er, (0, 2, 1)))

    x_c = x.astype(compute_dtype)
    w1m = w1m.astype(compute_dtype)
    w2cat = w2cat.astype(compute_dtype)
    w3s = w3s.astype(compute_dtype)

    flops = 2 * N * L * (Cin * Cm + 3 * Cm * Cm + (Cm + Cin) * Cout)
    bytes_accessed = int(
        x_c.size * x_c.dtype.itemsize + N * Cout * L * 4 + edge.size * 4
        + (w1m.size + w2cat.size + w3s.size) * x_c.dtype.itemsize
        + (b1c.size + b2c.size + b3s.size) * 4)

    kernel = functools.partial(_resblock_kernel, cm=Cm, tl=l_tile)

    out = pl.pallas_call(
        kernel,
        out_shape=jax.ShapeDtypeStruct((N, Cout, L), jnp.float32),
        grid_spec=pltpu.PrefetchScalarGridSpec(
            num_scalar_prefetch=0,
            grid=(N, T),
            in_specs=[
                pl.BlockSpec((1, Cin, l_tile), lambda n, j: (n, 0, j)),      # x tile (lane-dense L)
                pl.BlockSpec((1, 1, Cm, 2),    lambda n, j: (n, j, 0, 0)),   # halo contributions
                pl.BlockSpec((Cm, Cin),        lambda n, j: (0, 0)),         # W1
                pl.BlockSpec((Cm, 1),          lambda n, j: (0, 0)),         # b1
                pl.BlockSpec((3 * Cm, Cm),     lambda n, j: (0, 0)),         # [W2_k0; W2_k1; W2_k2]
                pl.BlockSpec((Cm, 1),          lambda n, j: (0, 0)),         # b2
                pl.BlockSpec((Cout, Cm + Cin), lambda n, j: (0, 0)),         # [W3 | Ws]
                pl.BlockSpec((Cout, 1),        lambda n, j: (0, 0)),         # b3 + bs
            ],
            out_specs=pl.BlockSpec((1, Cout, l_tile), lambda n, j: (n, 0, j)),
        ),
        compiler_params=pltpu.CompilerParams(
            dimension_semantics=("parallel", "parallel"),   # megacore sharding on v7x
            vmem_limit_bytes=min(_vmem_capacity_bytes() // 2, 64 * 1024 * 1024),
        ),
        cost_estimate=pl.CostEstimate(flops=flops, transcendentals=0,
                                      bytes_accessed=bytes_accessed),
    )(x_c, edge, w1m, b1c, w2cat, b2c, w3s, b3s)
    return out


def init_params(key, in_channel, out_channel):
    """Deterministic synthetic init with PyTorch nn.Conv1d weight shapes (out, in, k)."""
    channel = out_channel // 4
    ks = jax.random.split(key, 8)
    w1 = jax.random.normal(ks[0], (channel, in_channel, 1), jnp.float32) * 0.2
    b1 = jax.random.normal(ks[1], (channel,), jnp.float32) * 0.1
    w2 = jax.random.normal(ks[2], (channel, channel, 3), jnp.float32) * 0.2
    b2 = jax.random.normal(ks[3], (channel,), jnp.float32) * 0.1
    w3 = jax.random.normal(ks[4], (out_channel, channel, 1), jnp.float32) * 0.2
    b3 = jax.random.normal(ks[5], (out_channel,), jnp.float32) * 0.1
    ws = jax.random.normal(ks[6], (out_channel, in_channel, 1), jnp.float32) * 0.2
    bs = jax.random.normal(ks[7], (out_channel,), jnp.float32) * 0.1
    return (w1, b1, w2, b2, w3, b3, ws, bs)


def resblock_reference(x, params):
    """Pure-JAX reference (NCL in/out, PyTorch Conv1d semantics) for validation."""
    w1, b1, w2, b2, w3, b3, ws, bs = params
    hi = lax.Precision.HIGHEST
    L = x.shape[-1]
    h1 = jax.nn.relu(jnp.einsum('oik,nil->nol', w1, x, precision=hi) + b1[None, :, None])
    h1p = jnp.pad(h1, ((0, 0), (0, 0), (1, 1)))
    h2 = (jnp.einsum('oi,nil->nol', w2[:, :, 0], h1p[:, :, 0:L],     precision=hi)
          + jnp.einsum('oi,nil->nol', w2[:, :, 1], h1p[:, :, 1:L + 1], precision=hi)
          + jnp.einsum('oi,nil->nol', w2[:, :, 2], h1p[:, :, 2:L + 2], precision=hi)
          + b2[None, :, None])
    h2 = jax.nn.relu(h2)
    h3 = jnp.einsum('oik,nil->nol', w3, h2, precision=hi) + b3[None, :, None]
    sc = jnp.einsum('oik,nil->nol', ws, x, precision=hi) + bs[None, :, None]
    return jax.nn.relu(h3 + sc)


if __name__ == "__main__":
    key = jax.random.PRNGKey(0)
    # (N, Cin, Cout, L, l_tile): first config exercises the multi-tile halo path (L=256 so two
    # lane-aligned 128-wide L tiles exist); second exercises the single full-L tile path.
    configs = [
        (2, 4, 16, 256, 128),
        (1, 8, 32, 128, 128),
    ]
    for (N, Cin, Cout, L, tl) in configs:
        key, kx, kp = jax.random.split(key, 3)
        x = jax.random.normal(kx, (N, Cin, L), jnp.float32)    # PyTorch NCL layout
        params = init_params(kp, Cin, Cout)

        y = jax.block_until_ready(resblock_forward(x, params, l_tile=tl))
        y_ref = resblock_reference(x, params)
        np.testing.assert_allclose(np.asarray(y), np.asarray(y_ref), rtol=1e-5, atol=1e-5)

    print("KERNEL_OK")
</pallas_src>

<mosaic_0001>
module attributes {stable_mosaic.version = 11 : i64} {
  func.func @_resblock_kernel(%arg0: i32, %arg1: i32, %arg2: memref<1x4x128xf32, #tpu.memory_space<vmem>>, %arg3: memref<1x1x4x2xf32, #tpu.memory_space<vmem>>, %arg4: memref<4x4xf32, #tpu.memory_space<vmem>>, %arg5: memref<4x1xf32, #tpu.memory_space<vmem>>, %arg6: memref<12x4xf32, #tpu.memory_space<vmem>>, %arg7: memref<4x1xf32, #tpu.memory_space<vmem>>, %arg8: memref<16x8xf32, #tpu.memory_space<vmem>>, %arg9: memref<16x1xf32, #tpu.memory_space<vmem>>, %arg10: memref<1x16x128xf32, #tpu.memory_space<vmem>>) attributes {dimension_semantics = [#tpu.dimension_semantics<parallel>, #tpu.dimension_semantics<parallel>], iteration_bounds = array<i64: 2, 2>, scalar_prefetch = 0 : i64, scratch_operands = 0 : i64, tpu.core_type = #tpu.core_type<tc>, window_params = [{transform_indices = @transform_0, window_bounds = array<i64: 1, 4, 128>}, {transform_indices = @transform_1, window_bounds = array<i64: 1, 1, 4, 2>}, {pipeline_mode = #tpu.pipeline_mode<synchronous>, transform_indices = @transform_2, window_bounds = array<i64: 4, 4>}, {pipeline_mode = #tpu.pipeline_mode<synchronous>, transform_indices = @transform_3, window_bounds = array<i64: 4, 1>}, {pipeline_mode = #tpu.pipeline_mode<synchronous>, transform_indices = @transform_4, window_bounds = array<i64: 12, 4>}, {pipeline_mode = #tpu.pipeline_mode<synchronous>, transform_indices = @transform_5, window_bounds = array<i64: 4, 1>}, {pipeline_mode = #tpu.pipeline_mode<synchronous>, transform_indices = @transform_6, window_bounds = array<i64: 16, 8>}, {pipeline_mode = #tpu.pipeline_mode<synchronous>, transform_indices = @transform_7, window_bounds = array<i64: 16, 1>}, {transform_indices = @transform_8, window_bounds = array<i64: 1, 16, 128>}]} {
    %c0 = arith.constant 0 : index
    %c0_0 = arith.constant 0 : index
    %c0_1 = arith.constant 0 : index
    %0 = vector.load %arg2[%c0, %c0_0, %c0_1] : memref<1x4x128xf32, #tpu.memory_space<vmem>>, vector<1x4x128xf32>
    %1 = vector.shape_cast %0 : vector<1x4x128xf32> to vector<4x128xf32>
    %c0_2 = arith.constant 0 : index
    %c0_3 = arith.constant 0 : index
    %2 = vector.load %arg4[%c0_2, %c0_3] : memref<4x4xf32, #tpu.memory_space<vmem>>, vector<4x4xf32>
    %cst = arith.constant dense<0.000000e+00> : vector<4x128xf32>
    %3 = tpu.matmul %2, %1, %cst {dimension_numbers = #tpu.dot_dimension_numbers<[1], [0], [0], [1], [0, 0, 1, 1], [], []>} : vector<4x4xf32>, vector<4x128xf32>, vector<4x128xf32> -> vector<4x128xf32>
    %c0_4 = arith.constant 0 : index
    %c0_5 = arith.constant 0 : index
    %4 = vector.load %arg5[%c0_4, %c0_5] : memref<4x1xf32, #tpu.memory_space<vmem>>, vector<4x1xf32>
    %5 = vector.broadcast %4 : vector<4x1xf32> to vector<4x128xf32>
    %6 = arith.addf %3, %5 : vector<4x128xf32>
    %cst_6 = arith.constant 0.000000e+00 : f32
    %7 = vector.broadcast %cst_6 : f32 to vector<4x128xf32>
    %8 = arith.maximumf %6, %7 : vector<4x128xf32>
    %c0_7 = arith.constant 0 : index
    %c0_8 = arith.constant 0 : index
    %9 = vector.load %arg6[%c0_7, %c0_8] : memref<12x4xf32, #tpu.memory_space<vmem>>, vector<12x4xf32>
    %cst_9 = arith.constant dense<0.000000e+00> : vector<12x128xf32>
    %10 = tpu.matmul %9, %8, %cst_9 {dimension_numbers = #tpu.dot_dimension_numbers<[1], [0], [0], [1], [0, 0, 1, 1], [], []>} : vector<12x4xf32>, vector<4x128xf32>, vector<12x128xf32> -> vector<12x128xf32>
    %11 = vector.extract_strided_slice %10 {offsets = [0, 0], sizes = [4, 128], strides = [1, 1]} : vector<12x128xf32> to vector<4x128xf32>
    %12 = vector.extract_strided_slice %10 {offsets = [4, 0], sizes = [4, 128], strides = [1, 1]} : vector<12x128xf32> to vector<4x128xf32>
    %13 = vector.extract_strided_slice %10 {offsets = [8, 0], sizes = [4, 128], strides = [1, 1]} : vector<12x128xf32> to vector<4x128xf32>
    %14 = tpu.iota {dimensions = array<i32: 1>} : vector<4x128xi32>
    %c0_10 = arith.constant 0 : index
    %c0_11 = arith.constant 0 : index
    %c0_12 = arith.constant 0 : index
    %c0_13 = arith.constant 0 : index
    %15 = vector.load %arg3[%c0_10, %c0_11, %c0_12, %c0_13] : memref<1x1x4x2xf32, #tpu.memory_space<vmem>>, vector<1x1x4x2xf32>
    %16 = vector.shape_cast %15 : vector<1x1x4x2xf32> to vector<4x2xf32>
    %c0_i32 = arith.constant 0 : i32
    %17 = vector.broadcast %c0_i32 : i32 to vector<4x128xi32>
    %18 = arith.cmpi eq, %14, %17 : vector<4x128xi32>
    %19 = vector.extract_strided_slice %16 {offsets = [0, 0], sizes = [4, 1], strides = [1, 1]} : vector<4x2xf32> to vector<4x1xf32>
    %c1_i32 = arith.constant 1 : i32
    %20 = tpu.dynamic_rotate %11 by %c1_i32 dim 1 : vector<4x128xf32>, i32 -> vector<4x128xf32>
    %21 = vector.shape_cast %19 : vector<4x1xf32> to vector<4x1xf32>
    %22 = vector.broadcast %21 : vector<4x1xf32> to vector<4x128xf32>
    %23 = arith.select %18, %22, %20 : vector<4x128xi1>, vector<4x128xf32>
    %c127_i32 = arith.constant 127 : i32
    %24 = vector.broadcast %c127_i32 : i32 to vector<4x128xi32>
    %25 = arith.cmpi eq, %14, %24 : vector<4x128xi32>
    %26 = vector.extract_strided_slice %16 {offsets = [0, 1], sizes = [4, 1], strides = [1, 1]} : vector<4x2xf32> to vector<4x1xf32>
    %c127_i32_14 = arith.constant 127 : i32
    %27 = tpu.dynamic_rotate %13 by %c127_i32_14 dim 1 : vector<4x128xf32>, i32 -> vector<4x128xf32>
    %28 = vector.shape_cast %26 : vector<4x1xf32> to vector<4x1xf32>
    %29 = vector.broadcast %28 : vector<4x1xf32> to vector<4x128xf32>
    %30 = arith.select %25, %29, %27 : vector<4x128xi1>, vector<4x128xf32>
    %31 = arith.addf %23, %12 : vector<4x128xf32>
    %32 = arith.addf %31, %30 : vector<4x128xf32>
    %c0_15 = arith.constant 0 : index
    %c0_16 = arith.constant 0 : index
    %33 = vector.load %arg7[%c0_15, %c0_16] : memref<4x1xf32, #tpu.memory_space<vmem>>, vector<4x1xf32>
    %34 = vector.broadcast %33 : vector<4x1xf32> to vector<4x128xf32>
    %35 = arith.addf %32, %34 : vector<4x128xf32>
    %cst_17 = arith.constant 0.000000e+00 : f32
    %36 = vector.broadcast %cst_17 : f32 to vector<4x128xf32>
    %37 = arith.maximumf %35, %36 : vector<4x128xf32>
    %38 = tpu.concatenate %37, %1 in 0 : vector<4x128xf32>, vector<4x128xf32> -> vector<8x128xf32>
    %c0_18 = arith.constant 0 : index
    %c0_19 = arith.constant 0 : index
    %39 = vector.load %arg8[%c0_18, %c0_19] : memref<16x8xf32, #tpu.memory_space<vmem>>, vector<16x8xf32>
    %cst_20 = arith.constant dense<0.000000e+00> : vector<16x128xf32>
    %40 = tpu.matmul %39, %38, %cst_20 {dimension_numbers = #tpu.dot_dimension_numbers<[1], [0], [0], [1], [0, 0, 1, 1], [], []>} : vector<16x8xf32>, vector<8x128xf32>, vector<16x128xf32> -> vector<16x128xf32>
    %c0_21 = arith.constant 0 : index
    %c0_22 = arith.constant 0 : index
    %41 = vector.load %arg9[%c0_21, %c0_22] : memref<16x1xf32, #tpu.memory_space<vmem>>, vector<16x1xf32>
    %42 = vector.broadcast %41 : vector<16x1xf32> to vector<16x128xf32>
    %43 = arith.addf %40, %42 : vector<16x128xf32>
    %cst_23 = arith.constant 0.000000e+00 : f32
    %44 = vector.broadcast %cst_23 : f32 to vector<16x128xf32>
    %45 = arith.maximumf %43, %44 : vector<16x128xf32>
    %c0_24 = arith.constant 0 : index
    %c0_25 = arith.constant 0 : index
    %c0_26 = arith.constant 0 : index
    %46 = vector.load %arg10[%c0_24, %c0_25, %c0_26] : memref<1x16x128xf32, #tpu.memory_space<vmem>>, vector<1x16x128xf32>
    %47 = vector.shape_cast %46 : vector<1x16x128xf32> to vector<16x128xf32>
    %48 = vector.shape_cast %45 : vector<16x128xf32> to vector<1x16x128xf32>
    tpu.vector_store %arg10[%c0_24, %c0_25, %c0_26], %48 {strides = array<i32>} : memref<1x16x128xf32, #tpu.memory_space<vmem>>, vector<1x16x128xf32>,
    return
  }
  func.func @transform_0(%arg0: i32, %arg1: i32) -> (i32, i32, i32) {
    %c0_i32 = arith.constant 0 : i32
    %c0_i32_0 = arith.constant 0 : i32
    return %arg0, %c0_i32, %arg1 : i32, i32, i32
  }
  func.func @transform_1(%arg0: i32, %arg1: i32) -> (i32, i32, i32, i32) {
    %c0_i32 = arith.constant 0 : i32
    %c0_i32_0 = arith.constant 0 : i32
    %c0_i32_1 = arith.constant 0 : i32
    return %arg0, %arg1, %c0_i32, %c0_i32_0 : i32, i32, i32, i32
  }
  func.func @transform_2(%arg0: i32, %arg1: i32) -> (i32, i32) {
    %c0_i32 = arith.constant 0 : i32
    %c0_i32_0 = arith.constant 0 : i32
    %c0_i32_1 = arith.constant 0 : i32
    return %c0_i32, %c0_i32_0 : i32, i32
  }
  func.func @transform_3(%arg0: i32, %arg1: i32) -> (i32, i32) {
    %c0_i32 = arith.constant 0 : i32
    %c0_i32_0 = arith.constant 0 : i32
    %c0_i32_1 = arith.constant 0 : i32
    return %c0_i32, %c0_i32_0 : i32, i32
  }
  func.func @transform_4(%arg0: i32, %arg1: i32) -> (i32, i32) {
    %c0_i32 = arith.constant 0 : i32
    %c0_i32_0 = arith.constant 0 : i32
    %c0_i32_1 = arith.constant 0 : i32
    return %c0_i32, %c0_i32_0 : i32, i32
  }
  func.func @transform_5(%arg0: i32, %arg1: i32) -> (i32, i32) {
    %c0_i32 = arith.constant 0 : i32
    %c0_i32_0 = arith.constant 0 : i32
    %c0_i32_1 = arith.constant 0 : i32
    return %c0_i32, %c0_i32_0 : i32, i32
  }
  func.func @transform_6(%arg0: i32, %arg1: i32) -> (i32, i32) {
    %c0_i32 = arith.constant 0 : i32
    %c0_i32_0 = arith.constant 0 : i32
    %c0_i32_1 = arith.constant 0 : i32
    return %c0_i32, %c0_i32_0 : i32, i32
  }
  func.func @transform_7(%arg0: i32, %arg1: i32) -> (i32, i32) {
    %c0_i32 = arith.constant 0 : i32
    %c0_i32_0 = arith.constant 0 : i32
    %c0_i32_1 = arith.constant 0 : i32
    return %c0_i32, %c0_i32_0 : i32, i32
  }
  func.func @transform_8(%arg0: i32, %arg1: i32) -> (i32, i32, i32) {
    %c0_i32 = arith.constant 0 : i32
    %c0_i32_0 = arith.constant 0 : i32
    return %arg0, %c0_i32, %arg1 : i32, i32, i32
  }
}

</mosaic_0001>

<bundles_post_ra>
// kernel: tpu_custom_call.1
= control target key start
LH: loop header
LB: loop body
LE: loop exit
PB: predicated region body
PF: predicated region fallthrough
CT: control target
= control target key end

     0   :  { %s1238_s0 = inlined_call_operand.vmem [shape: f32[2,4,256], index: 0, kind: input, shape index: {}]   ;;  %s1239_s1 = inlined_call_operand.vmem [shape: f32[2,2,4,2], index: 1, kind: input, shape index: {}]   ;;  %s1240_s2 = inlined_call_operand.vmem [shape: f32[4,4], index: 2, kind: input, shape index: {}]   ;;  %s1241_s3 = inlined_call_operand.vmem [shape: f32[4,1], index: 3, kind: input, shape index: {}]   ;;  %s1242_s4 = inlined_call_operand.vmem [shape: f32[12,4], index: 4, kind: input, shape index: {}]   ;;  %s1243_s5 = inlined_call_operand.vmem [shape: f32[4,1], index: 5, kind: input, shape index: {}]   ;;  %s1244_s6 = inlined_call_operand.vmem [shape: f32[16,8], index: 6, kind: input, shape index: {}]   ;;  %s1245_s7 = inlined_call_operand.vmem [shape: f32[16,1], index: 7, kind: input, shape index: {}]   ;;  %s1246_s8 = inlined_call_operand.hbm [shape: f32[2,16,256], index: 8, kind: output, shape index: {}]  }
   0x1   :  { %1250 = sst [smem:[#allocation8_spill]] %s1241_s3 }
   0x2   :  { %13 = vsyncpa [#allocation3], 0 }
   0x3   :  { %15 = vsyncpa [#allocation3 + $0x1], 0  ;;  %s1060_s27 = smov 0   ;;  %s1062_s28 = smov 0  }
   0x4   :  { %s1064_s29 = smov 0   ;;  %s1066_s30 = smov 0  }
   0x5   :  { %s1068_s9 = smov 0   ;;  %s1070_s10 = smov 0  }
   0x6   :  { %s1072_s11 = smov 0   ;;  %s1074_s12 = smov 0  }
   0x7 LB: > { %1251 = sst [smem:[#allocation5_spill]] %s999_s11  ;;  %s783_s13 = sadd.s32 4294967295, %s1003_s12   ;;  %s1003_s12 = sphi %s1074_s12, %s21_s12   ;;  %s999_s11 = sphi %s1072_s11, %s1259_s11   ;;  %s995_s10 = sphi %s1070_s10, %s1264_s10   ;;  %s991_s9 = sphi %s1068_s9, %s1257_s9   ;;  %s987_s30 = sphi %s1066_s30, %s1263_s30   ;;  %s983_s29 = sphi %s1064_s29, %s1262_s29   ;;  %s979_s28 = sphi %s1062_s28, %s1261_s28   ;;  %s975_s27 = sphi %s1060_s27, %s1260_s27  }
   0x8   : > { %s784_s14 = sadd.s32 4294967294, %s1003_s12   ;;  %s30_s15 = sadd.s32 1, %s995_s10 }
   0x9   : > { %p31_p0 = scmp.ge.s32.totalorder %s30_s15, 2  ;;  %s33_s16 = sadd.s32 1, %s999_s11 }
   0xa   : > { %p234_p1 = scmp.ne.s32.totalorder %s983_s29, %s979_s28  ;;  %p235_p2 = scmp.eq.s32.totalorder %s783_s13, 3 }
   0xb   : > { %s1266_s15 = smov (%p31_p0, %s30_s15), 0  ;;  %s1268_s16 = smov (!%p31_p0, %s33_s16), %s999_s11 }
   0xc   : > { %1252 = sst [smem:[#allocation6_spill]] %s1266_s15  ;;  %s220_s17 = ssub.s32 %s995_s10, %s1266_s15 }
   0xd   : > { %p1111_p3 = por %p235_p2, %p234_p1  ;;  %p35_p4 = scmp.ge.s32.totalorder %s1268_s16, 2 }
   0xe   : > { %p240_p5 = scmp.ne.s32.totalorder %s979_s28, %s975_s27  ;;  %p241_p6 = scmp.eq.s32.totalorder %s784_s14, 3 }
   0xf   : > { %p787_p7 = scmp.ge.s32.totalorder %s1003_s12, 1  ;;  %s1270_s16 = smov (%p35_p4, %s1268_s16), 0 }
  0x10   : > { %1254 = sst [smem:[#allocation7_spill]] %s1270_s16  ;;  %p1120_p8 = por %p241_p6, %p240_p5 }
  0x11   : > { %p299_p9 = scmp.lt.s32.totalorder %s1003_s12, 5  ;;  %s219_s20 = ssub.s32 %s999_s11, %s1270_s16 }
  0x12   : > { %s224_s21 = sadd.s32 1, %s983_s29  ;;  %s221_s22 = sor.u32 %s220_s17, %s219_s20 }
  0x13   : > { %p300_p10 = pnand %p787_p7, %p299_p9  ;;  %p222_p11 = scmp.eq.s32.totalorder %s221_s22, 0 }
  0x14   : > { %p344_p12 = scmp.lt.s32.totalorder (!%p300_p10), %s991_s9, 1  ;;  %p346_p13 = scmp.lt.s32.totalorder (!%p300_p10), %s987_s30, 1 }
  0x15   : > { %s1129_s23 = scalar_select %p222_p11, %s983_s29, %s224_s21  }
  0x16   : > { %303 = sbr.rel (%p300_p10) target bundleno = 772 (0x304), region = 52  ;;  %s1256_s3 = sld [smem:[#allocation8_spill]] (!%p300_p10) }
  0x17   : > { %s1009_s22 = smov (!%p300_p10), 1   ;;  %s1010_s24 = smov (!%p300_p10), 127  }
  0x18   : > { %s341_s11 = sand.u32 (!%p300_p10), 1, %s979_s28  }
  0x19   : > { %s788_s15 = sshll.u32 (!%p300_p10), %s341_s11, 4 }
  0x1b   : > { %v1005_v0 = vmov 0.0   ;;  %vm1006_vm0 = vmmov 0   ;;  %s345_s26 = scalar_select %p344_p12, %s991_s9, 1  ;;  %v1007_v2 = vmov 0   ;;  %vm372_vm1 = vcmask 1043456   ;;  %v571_v7 = vld [vmem:[%s1245_s7] sm:$0xff] }
  0x1c   : > { %813 = vmatprep.subr.mxu0 %v1005_v0  ;;  %815 = vmatprep.mubr.msk.f32.mxu0 %vm1006_vm0, %v1005_v0  ;;  %v362_v1 = vld [vmem:[%s1256_s3] sm:$0xf]  ;;  %s347_s13 = scalar_select %p346_p13, %s987_s30, 1  ;;  %vm368_vm2 = vcmask 31744   ;;  %v1008_v9 = vmov 1   ;;  %vm583_vm3 = vcmask 64512   ;;  %v533_v20 = vlaneseq }
  0x1d   : > { %908 = vset.pattern.permute.xlu0 %v1007_v2  ;;  %s789_s14 = sshll.u32 %s345_s26, 1  ;;  %v361_v3 = vld [vmem:[%s1240_s2] sm:$0xf]  ;;  %909 = vset.pattern.permute.xlu1 %v1008_v9  ;;  %v448_v15 = vld [vmem:[%s1242_s4 + $0x8] sm:$0xf]  ;;  %s1011_s26 = smov [#allocation2]  }
  0x1e   : > { %365 = vperm.xlu0 %908, %v362_v1   ;;  %s349_s17 = sadd.s32 %s789_s14, %s347_s13  ;;  %v558_v6 = vld [vmem:[%s1243_s5] sm:$0xf]  ;;  %v572_v19 = vld [vmem:[%s1245_s7 + $0x8] sm:$0xff]  ;;  %v534_v22 = vand.u32 127, %v533_v20  ;;  %s915_s13 = sshll.u32 %s1011_s26, 4  ;;  %s916_s13 = int_to_ptr.vmem [resolvable:$false] %s915_s13 }
  0x1f   : > { %s790_s20 = sshll.u32 %s349_s17, 2  ;;  %v447_v8 = vld [vmem:[%s1242_s4] sm:$0xff]  ;;  %v570_v36 = vld [vmem:[%s1244_s6 + $0x8] sm:$0xff]  ;;  %s801_s17 = sshll.u32 %s991_s9, 2 }
  0x20   : > { %s351_s16 = scalar_lea.vmem %s1238_s0, %s790_s20  ;;  %s359_s3 = scalar_lea.vmem %s1239_s1, %s790_s20  ;;  %820 = vmatprep.mubr.msk.f32.mxu1 %vm368_vm2, %v447_v8  ;;  %v569_v18 = vld [vmem:[%s1244_s6] sm:$0xff]  ;;  %vm536_vm4 = vcmp.eq.s32.totalorder %v534_v22, 0  ;;  %vm545_vm5 = vcmp.eq.s32.totalorder %v534_v22, 127 }
  0x21   : > { %v360_v4 = vld [vmem:[%s351_s16] sm:$0xf]  ;;  %s343_s16 = scalar_lea.vmem [#allocation2], %s788_s15  ;;  %s917_s14 = scalar_lea.vmem %s916_s13, 512 }
  0x22   : > { %v535_v5 = vld [vmem:[%s359_s3] sm:$0xf]  ;;  %814 = vmatpush3.msk.msra.mxu0 %vm372_vm1, %v360_v4  ;;  %v566_v32 = vrot.slane %v360_v4, 4  ;;  %s681_s3 = sadd.s32 %s987_s30, %s801_s17  ;;  %s684_s20 = sshll.u32 %s343_s16, 4  ;;  %s1180_s20 = int_to_ptr.vmem [resolvable:$true] %s684_s20 }
  0x23   : > { %541 = vperm.xlu0 %908, %v535_v5   ;;  %816 = vmatmul.mubr.msk.f32.vlgmr.msra.gmra.mxu0 %vm368_vm2, %v361_v3  ;;  %s802_s21 = sshll.u32 %s681_s3, 7  ;;  %s1187_s30 = scalar_lea.sflag [#allocation3], %s341_s11 }
  0x24   : > { %549 = vperm.xlu1 %909, %v535_v5   ;;  %825 = vmatprep.mubr.msk.f32.mxu0 %vm583_vm3, %v569_v18  ;;  %s1185_s9 = scalar_lea.hbm %s1246_s8, %s802_s21  ;;  %s911_s25 = scalar_lea.vmem %s1180_s20, 256 }
  0x25   : > { %p912_p0 = scmp.ne.s32.totalorder %s1180_s20, %s911_s25  ;;  %p918_p4 = scmp.lt.s32.totalorder %s1180_s20, %s916_s13 }
  0x26   : > { %p919_p5 = scmp.lt.s32.totalorder %s917_s14, %s911_s25 }
  0x27   : > { %561 = vperm.xlu0 %908, %v558_v6   ;;  %p913_p1 = pnand %p912_p0, %p1111_p3 }
  0x28   : > { %910 = vset.pattern.permute.xlu1 %v1007_v2  ;;  %p920_p6 = por %p919_p5, %p918_p4 }
  0x29   : > { %p914_p2 = pneg %p913_p1 }
  0x2b   : > { %575 = vperm.xlu0 %908, %v571_v7   ;;  %p921_p7 = pnand %p920_p6, %p914_p2 }
  0x99   : > { %v366_v10 = vpop.permute.xlu0 %365 }
  0x9e   : > { %v542_v23 = vpop.permute.xlu0 %541 }
  0x9f   : > { %v550_v21 = vpop.permute.xlu1 %549 }
  0xa2   : > { %v562_v31 = vpop.permute.xlu0 %561 }
  0xa6   : > { %v576_v40 = vpop.permute.xlu0 %575 }
  0xe3   : > { %v442_v11 = vpop.f32.mrf.mxu0 }
  0xe4   : > { %v443_v12 = vadd.f32 %v442_v11, %v366_v10 }
  0xe5   : > { %v817_v13 = vpop.f32.mrf.mxu0 }
  0xe6   : > { %v446_v14 = vmax.f32 %v443_v12, 0.0 }
  0xe8   : > { %818 = vmatprep.subr.msk.mxu1 %vm372_vm1, %v446_v14 }
  0xe9   : > { %819 = vmatpush3.msk.msra.mxu1 %vm372_vm1, %v446_v14 }
  0xea   : > { %821 = vmatmul.mubr.msk.f32.vlgmr.msra.gmra.mxu1 %vm368_vm2, %v448_v15 }
 0x1aa   : > { %v822_v16 = vpop.f32.mrf.mxu1 }
 0x1ac   : > { %v524_v17 = vpop.f32.mrf.mxu1 }
 0x1ad   : > { %537 = vrot.lane.b32.xlu1 %v524_v17, %s1009_s22  ;;  %v554_v26 = vrot.slane %v524_v17, 4 }
 0x1b1   : > { %546 = vrot.lane.b32.xlu1 %v822_v16, %s1010_s24 }
 0x1b5   : > { %580 = vperm.xlu1 %910, %v572_v19  }
 0x21f   : > { %v538_v24 = vpop.permute.xlu1 %537 }
 0x220   : > { %v544_v25 = vsel %vm536_vm4, %v542_v23, %v538_v24 }
 0x221   : > { %v556_v27 = vadd.f32 %v554_v26, %v544_v25 }
 0x223   : > { %v547_v28 = vpop.permute.xlu1 %546 }
 0x224   : > { %v552_v29 = vsel %vm545_vm5, %v550_v21, %v547_v28 }
 0x225   : > { %v557_v30 = vadd.f32 %v556_v27, %v552_v29 }
 0x227   : > { %v564_v33 = vadd.f32 %v562_v31, %v557_v30 }
 0x229   : > { %v565_v34 = vmax.f32 %v564_v33, 0.0 }
 0x22b   : > { %v568_v35 = vsel %vm372_vm1, %v565_v34, %v566_v32 }
 0x22c   : > { %823 = vmatprep.subr.mxu0 %v568_v35 }
 0x22d   : > { %824 = vmatpush3.msra.mxu0 %v568_v35 }
 0x22e   : > { %826 = vmatmul.mubr.msk.f32.vlgmr.msra.gmra.mxu0 %vm583_vm3, %v570_v36 }
 0x230   : > { %v581_v37 = vpop.permute.xlu1 %580 }
 0x2ee   : > { %v827_v38 = vpop.f32.mrf.mxu0 }
 0x2ef   : > { %v662_v39 = vadd.f32 %v827_v38, %v581_v37 }
 0x2f0   : > { %v656_v41 = vpop.f32.mrf.mxu0 }
 0x2f1   : > { %v657_v42 = vadd.f32 %v656_v41, %v576_v40  ;;  %v666_v43 = vmax.f32 %v662_v39, 0.0 }
 0x2f3   : > { %v665_v44 = vmax.f32 %v657_v42, 0.0  ;;  %668 = vst [vmem:[%s343_s16 + $0x8] sm:$0xff] %v666_v43 }
 0x2f5   : > { %667 = vst [vmem:[%s343_s16] sm:$0xff] %v665_v44 }
 0x2f6   : > { %924 = shalt.err (!%p921_p7)
}
 0x2f7   : > { %s925_s11 = scalar_lea.hbm %s1185_s9, 256  ;;  %s929_s3 = scalar_lea.hbm %s1246_s8, 1024 }
 0x2f8   : > { %p926_p9 = scmp.ne.s32.totalorder %s1185_s9, %s925_s11  ;;  %p930_p12 = scmp.lt.s32.totalorder %s1185_s9, %s1246_s8 }
 0x2f9   : > { %p931_p13 = scmp.lt.s32.totalorder %s929_s3, %s925_s11 }
 0x2fa   : > { %p927_p10 = pnand %p926_p9, %p1111_p3 }
 0x2fb   : > { %p932_p0 = por %p931_p13, %p930_p12 }
 0x2fc   : > { %p928_p11 = pneg %p927_p10 }
 0x2fe   : > { %p933_p1 = pnand %p932_p0, %p928_p11 }
 0x300   : > { %936 = shalt.err (!%p933_p1)
}
 0x301   : > { %s1012_s22 = smov 128   ;;  %s1013_s24 = smov 256  }
 0x302   : > { %s1014_s25 = smov 8  }
 0x303   : > { %828 = dma.vmem_to_hbm [thread:$0]  (%p1111_p3), %s1180_s20, 256, %s1185_s9, %s1187_s30, %s1012_s22, %s1013_s24, %s1014_s25  }
 0x304 PF: > { %p834_p2 = scmp.ge.s32.totalorder %s1003_s12, 2  ;;  %s699_s26 = sand.u32 1, %s975_s27  }
 0x305   : > { %s700_s13 = scalar_lea.sflag [#allocation3], %s699_s26 }
 0x306   : > { %p831_p4 = pnand %p834_p2, %p1120_p8 }
 0x308   : > { %p832_p5 = pneg %p831_p4 }
 0x30a   : > { %970 = dma.done.wait (%p832_p5), %s700_s13, 256  }
 0x30b   : > { %972 = vsyncadd (%p832_p5), %s700_s13, 4294967040  ;;  %s21_s12 = sadd.s32 1, %s1003_s12   ;;  %s1257_s9 = sld [smem:[#allocation5_spill]] }
 0x30c   : > { %p18_p6 = scmp.ge.s32.totalorder %s21_s12, 6   ;;  %s1258_s18 = sld [smem:[#allocation6_spill]] }
 0x30d   : > { %s1259_s11 = sld [smem:[#allocation7_spill]]  ;;  %s1260_s27 = smov %s979_s28 }
 0x30e   : > { %s1261_s28 = smov %s983_s29  ;;  %s1262_s29 = smov %s1129_s23 }
 0x30f   : > { %s1263_s30 = smov %s995_s10  ;;  %20 = sbr.rel (!%p18_p6) target bundleno = 7 (0x7), region = 90 }
 0x312   : > { %s1264_s10 = smov %s1258_s18 }
 0x314   :  { %705 = vsyncpa [#allocation3], 1 }
 0x315   :  { %707 = vsyncpa [#allocation3 + $0x1], 1 }

</bundles_post_ra>
